<compile_context>
chip_gen: v5e
topology: v5e:2x2
jax: 0.10.0
libtpu: 0.0.40
codegen_flags: <defaults>
</compile_context>

<pallas_src>
import functools

import jax
import jax.numpy as jnp
from jax.experimental import pallas as pl
from jax.experimental.pallas import tpu as pltpu


# ---------------------------------------------------------------------------
# standalone forward: out = sum(features * hidden_state) -> shape (1,)
# (kept as a minimal lane-dense kernel; for throughput prefer the fused scan)
# ---------------------------------------------------------------------------
def _forward_kernel(f_ref, h_ref, o_ref):
    # (1, N) * (1, N) on the VPU, full reduce, single scalar store to SMEM.
    o_ref[0] = jnp.sum(f_ref[...] * h_ref[...])


def feature_rnn_fb_forward(features, hidden_state):
    """features, hidden_state: (N,) float32 -> (1,) float32 (module.forward)."""
    n = features.shape[0]
    f2 = features.astype(jnp.float32).reshape(1, n)
    h2 = hidden_state.astype(jnp.float32).reshape(1, n)
    return pl.pallas_call(
        _forward_kernel,
        out_shape=jax.ShapeDtypeStruct((1,), jnp.float32),
        in_specs=[
            pl.BlockSpec((1, n), lambda: (0, 0)),
            pl.BlockSpec((1, n), lambda: (0, 0)),
        ],
        out_specs=pl.BlockSpec(memory_space=pltpu.SMEM),
    )(f2, h2)


# ---------------------------------------------------------------------------
# fused scan kernel: one grid point per sequence, time fully unrolled inside.
#   serial chain per step:  h <- VPU/XLU matvec(h, W_hh[sel_t]) + xwb[t]
#   forward output per step accumulated into a lane-dense (1, T) row.
# ---------------------------------------------------------------------------
def _scan_kernel(rew_ref, f_ref, xwb_ref, h0_ref, w_hh_ref,
                 out_ref, hfin_ref, *, seq_len, hidden_size):
    b = pl.program_id(0)
    H = hidden_size

    F = f_ref[...]        # (T, H) features for this sequence
    XWB = xwb_ref[...]    # (T, H) precomputed x_t @ W_in[sel_t] + b[sel_t]
    h = h0_ref[...]       # (1, H) hidden state, lane-dense row carry

    # (H, H) identity (compile-time constant): moves the (1,H) row into an
    # (H,1) column via a lane reduce — no transpose, no MXU.
    eye = (jax.lax.broadcasted_iota(jnp.int32, (H, H), 0)
           == jax.lax.broadcasted_iota(jnp.int32, (H, H), 1)).astype(jnp.float32)

    out_acc = jnp.zeros((1, seq_len), jnp.float32)

    # Fully unrolled at trace time (seq_len is a compile-time constant), so all
    # slices of F / XWB and the one-hot masks below are static.
    for t in range(seq_len):
        # module.forward at step t: sum(features_t * h_t)
        out_val = jnp.sum(F[t:t + 1, :] * h)
        onehot = (jax.lax.broadcasted_iota(jnp.int32, (1, seq_len), 1)
                  == t).astype(jnp.float32)
        out_acc = out_acc + out_val * onehot

        # reward-selected hidden->hidden plane: dynamic first-axis ref index
        # loads only the selected (H, H) plane.
        sel_t = rew_ref[b * seq_len + t]
        w_hh_t = w_hh_ref[sel_t]                                    # (H, H)

        # serial update on the VPU/XLU (exact f32):
        #   h_col[k]  = h[k]                        (row -> column, lane reduce)
        #   h_new[j]  = sum_k h[k] * W_hh[k, j]     (broadcast-mul + sublane reduce)
        h_col = jnp.sum(h * eye, axis=1, keepdims=True)             # (H, 1)
        h = jnp.sum(h_col * w_hh_t, axis=0, keepdims=True) + XWB[t:t + 1, :]

    out_ref[...] = out_acc        # single lane-dense store of all T outputs
    hfin_ref[...] = h             # final hidden written once, after the loop


def feature_rnn_fb_scan_batched(params, features_seq, inputs_seq, hidden0, rewards):
    """Run B independent T-step recurrences in ONE pallas_call.

    features_seq: (B, T, H), inputs_seq: (B, T, I), hidden0: (B, H), rewards: (B, T)
    Returns (per-step forward outputs (B, T), final hidden (B, H)).
    """
    f = features_seq.astype(jnp.float32)
    x = inputs_seq.astype(jnp.float32)
    h0 = hidden0.astype(jnp.float32)
    B, T, H = f.shape

    sel = jnp.asarray(rewards) == 1                                      # (B, T)
    # Hoisted off the serial chain: x_t @ W_in + bias for both planes as one
    # batched MXU matmul (exact-precision), reward-selected per step.
    xw = jnp.einsum('bti,pih->pbth', x, params['w_in'],
                    precision=jax.lax.Precision.HIGHEST)                 # (2, B, T, H)
    xwb = jnp.where(sel[..., None], xw[1] + params['b'][1], xw[0] + params['b'][0])

    rew_flat = sel.astype(jnp.int32).reshape(B * T)                      # 0=inc, 1=cor

    outs, h_fin = pl.pallas_call(
        functools.partial(_scan_kernel, seq_len=T, hidden_size=H),
        out_shape=(
            jax.ShapeDtypeStruct((B, 1, T), jnp.float32),   # per-step forward outputs
            jax.ShapeDtypeStruct((B, 1, H), jnp.float32),   # final hidden
        ),
        grid_spec=pltpu.PrefetchScalarGridSpec(
            num_scalar_prefetch=1,
            grid=(B,),
            in_specs=[
                pl.BlockSpec((None, T, H), lambda b, r: (b, 0, 0)),      # features
                pl.BlockSpec((None, T, H), lambda b, r: (b, 0, 0)),      # xwb
                pl.BlockSpec((None, 1, H), lambda b, r: (b, 0, 0)),      # h0
                pl.BlockSpec((2, H, H), lambda b, r: (0, 0, 0)),         # W_hh resident
            ],
            out_specs=(
                pl.BlockSpec((None, 1, T), lambda b, r: (b, 0, 0)),
                pl.BlockSpec((None, 1, H), lambda b, r: (b, 0, 0)),
            ),
        ),
        # batch axis sharded across TensorCores on v7x; harmless on v5e/v6e.
        compiler_params=pltpu.CompilerParams(dimension_semantics=("parallel",)),
    )(rew_flat, f, xwb, h0.reshape(B, 1, H), params['w_hh'])
    return outs.reshape(B, T), h_fin.reshape(B, H)


def feature_rnn_fb_scan(params, features_seq, inputs_seq, hidden0, rewards):
    """Unbatched convenience wrapper: (T,H),(T,I),(H,),(T,) -> ((T,), (H,))."""
    outs, h_fin = feature_rnn_fb_scan_batched(
        params, features_seq[None], inputs_seq[None], hidden0[None],
        jnp.asarray(rewards)[None])
    return outs[0], h_fin[0]


def feature_rnn_fb_step(params, features, input_state, hidden_state, reward):
    """One fused step (forward + update_hidden), routed through the scan kernel
    with T=1 (single launch). For throughput, batch whole sequences through
    feature_rnn_fb_scan_batched instead of stepping one call at a time."""
    r = jnp.asarray(reward).reshape(1, 1)
    outs, h_fin = feature_rnn_fb_scan_batched(
        params,
        features.reshape(1, 1, -1),
        input_state.reshape(1, 1, -1),
        hidden_state.reshape(1, -1),
        r)
    return outs.reshape(1), h_fin.reshape(-1)


def feature_rnn_fb_update_hidden(params, input_state, hidden_state, reward):
    """module.update_hidden (the fused step's discarded dot product is free)."""
    _, h_new = feature_rnn_fb_step(params, hidden_state, input_state, hidden_state, reward)
    return h_new


# ---------------------------------------------------------------------------
# parameter init: nn.Linear-shaped weights, pre-transposed & split ONCE.
#   plane 0 = hh_inc (reward != 1), plane 1 = hh_cor (reward == 1)
# ---------------------------------------------------------------------------
def init_params(key, input_size, hidden_size):
    c = input_size + hidden_size
    h = hidden_size
    k1, k2, k3, k4 = jax.random.split(key, 4)
    bound = 1.0 / (c ** 0.5)
    w_cor = jax.random.uniform(k1, (h, c), jnp.float32, -bound, bound)   # nn.Linear (H, C)
    b_cor = jax.random.uniform(k2, (h,), jnp.float32, -bound, bound)
    w_inc = jax.random.uniform(k3, (h, c), jnp.float32, -bound, bound)
    b_inc = jax.random.uniform(k4, (h,), jnp.float32, -bound, bound)
    w_t = jnp.stack([w_inc.T, w_cor.T])                   # (2, C, H) pre-transposed
    return {
        'w_in': w_t[:, :input_size, :],                   # (2, I, H) input half
        'w_hh': w_t[:, input_size:, :],                   # (2, H, H) hidden half
        'b': jnp.stack([b_inc, b_cor]),                   # (2, H)
    }


def init_hidden(hidden_size):
    return jnp.zeros((hidden_size,), jnp.float32)


if __name__ == "__main__":
    input_size, hidden_size, seq_len, batch = 32, 32, 8, 2

    key = jax.random.PRNGKey(0)
    kp, kf, kh, ki, kr, kfs, kis = jax.random.split(key, 7)

    params = init_params(kp, input_size, hidden_size)
    w_full = jnp.concatenate([params['w_in'], params['w_hh']], axis=1)   # (2, C, H)

    features = jax.random.normal(kf, (hidden_size,), jnp.float32)
    hidden_state = jax.random.normal(kh, (hidden_size,), jnp.float32)
    input_state = jax.random.normal(ki, (input_size,), jnp.float32)

    # 1) standalone forward (module.forward)
    out = jax.block_until_ready(feature_rnn_fb_forward(features, hidden_state))
    ref_out = jnp.sum(features * hidden_state).reshape(1)
    assert out.shape == (1,)
    assert jnp.allclose(out, ref_out, rtol=1e-5, atol=1e-5), (out, ref_out)

    # 2) fused step (forward + update_hidden), both reward branches
    hh1 = jnp.concatenate([input_state, hidden_state])
    for reward in (1, 0):
        o, h_new = jax.block_until_ready(
            feature_rnn_fb_step(params, features, input_state, hidden_state, reward))
        p = 1 if reward == 1 else 0
        ref_h = jnp.sum(hh1[:, None] * w_full[p], axis=0) + params['b'][p]
        assert o.shape == (1,)
        assert jnp.allclose(o, ref_out, rtol=1e-5, atol=1e-5), (o, ref_out)
        assert jnp.allclose(h_new, ref_h, rtol=1e-4, atol=1e-4), (reward, h_new, ref_h)
        h_only = jax.block_until_ready(
            feature_rnn_fb_update_hidden(params, input_state, hidden_state, reward))
        assert jnp.allclose(h_only, ref_h, rtol=1e-4, atol=1e-4)

    # 3) batched T-step recurrence: ONE pallas_call, one grid point per sequence
    features_seq = jax.random.normal(kfs, (batch, seq_len, hidden_size), jnp.float32)
    inputs_seq = jax.random.normal(kis, (batch, seq_len, input_size), jnp.float32)
    rewards = jax.random.bernoulli(kr, 0.5, (batch, seq_len)).astype(jnp.int32)
    h0 = jnp.tile(init_hidden(hidden_size)[None], (batch, 1))

    outs, h_fin = jax.block_until_ready(
        feature_rnn_fb_scan_batched(params, features_seq, inputs_seq, h0, rewards))
    assert outs.shape == (batch, seq_len)
    assert h_fin.shape == (batch, hidden_size)

    # pure-JAX reference (exact f32 elementwise math); the serial hh update in
    # the kernel is exact-VPU f32, so the tolerance is tight (was 2e-2 before).
    for bi in range(batch):
        h_ref = init_hidden(hidden_size)
        ref_outs = []
        for t in range(seq_len):
            ref_outs.append(jnp.sum(features_seq[bi, t] * h_ref))
            p = int(rewards[bi, t] == 1)
            hh1_t = jnp.concatenate([inputs_seq[bi, t], h_ref])
            h_ref = jnp.sum(hh1_t[:, None] * w_full[p], axis=0) + params['b'][p]
        ref_outs = jnp.stack(ref_outs)
        assert jnp.allclose(outs[bi], ref_outs, rtol=1e-4, atol=1e-4), (bi, outs[bi], ref_outs)
        assert jnp.allclose(h_fin[bi], h_ref, rtol=1e-4, atol=1e-4), (bi, h_fin[bi], h_ref)

    # 4) unbatched convenience wrapper agrees with the batched path
    outs1, hfin1 = jax.block_until_ready(feature_rnn_fb_scan(
        params, features_seq[0], inputs_seq[0], init_hidden(hidden_size), rewards[0]))
    assert jnp.allclose(outs1, outs[0], rtol=1e-6, atol=1e-6)
    assert jnp.allclose(hfin1, h_fin[0], rtol=1e-6, atol=1e-6)

    print("KERNEL_OK")
</pallas_src>

<mosaic_0001>
module attributes {stable_mosaic.version = 11 : i64} {
  func.func @_forward_kernel(%arg0: memref<1x32xf32, #tpu.memory_space<vmem>>, %arg1: memref<1x32xf32, #tpu.memory_space<vmem>>, %arg2: memref<1xf32, #tpu.memory_space<smem>>) attributes {dimension_semantics = [], scalar_prefetch = 0 : i64, scratch_operands = 0 : i64, tpu.core_type = #tpu.core_type<tc>} {
    %c0 = arith.constant 0 : index
    %c0_0 = arith.constant 0 : index
    %0 = vector.load %arg0[%c0, %c0_0] : memref<1x32xf32, #tpu.memory_space<vmem>>, vector<1x32xf32>
    %c0_1 = arith.constant 0 : index
    %c0_2 = arith.constant 0 : index
    %1 = vector.load %arg1[%c0_1, %c0_2] : memref<1x32xf32, #tpu.memory_space<vmem>>, vector<1x32xf32>
    %2 = arith.mulf %0, %1 : vector<1x32xf32>
    %3 = vector.shape_cast %2 : vector<1x32xf32> to vector<1x1x32xf32>
    %cst = arith.constant dense<0.000000e+00> : vector<1xf32>
    %4 = vector.multi_reduction <add>, %3, %cst [1, 2] : vector<1x1x32xf32> to vector<1xf32>
    %5 = vector.shape_cast %4 : vector<1xf32> to vector<1x1x1xf32>
    %6 = vector.extract %5[0, 0, 0] : f32 from vector<1x1x1xf32>
    %c0_3 = arith.constant 0 : index
    %7 = memref.load %arg2[%c0_3] : memref<1xf32, #tpu.memory_space<smem>>
    memref.store %6, %arg2[%c0_3] : memref<1xf32, #tpu.memory_space<smem>>
    return
  }
}

</mosaic_0001>

<bundles_post_ra>
// kernel: tpu_custom_call.1
= control target key start
LH: loop header
LB: loop body
LE: loop exit
PB: predicated region body
PF: predicated region fallthrough
CT: control target
= control target key end

     0   :  { %7 = vsyncpa [#allocation3], 0  ;;  %s171_s0 = inlined_call_operand.hbm [shape: f32[1,32], index: 0, kind: input, shape index: {}]   ;;  %s172_s1 = inlined_call_operand.hbm [shape: f32[1,32], index: 1, kind: input, shape index: {}]   ;;  %s173_s2 = inlined_call_operand.hbm [shape: f32[1], index: 2, kind: output, shape index: {}]  }
   0x1   :  { %8 = vsyncpa [#allocation6], 0 }
   0x2   :  { %9 = vsyncpa [#allocation4], 0  ;;  %s15_s11 = sshll.u32 %s171_s0, 4  ;;  %s144_s12 = smov [#allocation2]   ;;  %s16_s11 = int_to_ptr.hbm [resolvable:$true] %s15_s11 }
   0x3   :  { %s17_s13 = sshll.u32 %s144_s12, 4  ;;  %s26_s16 = sshll.u32 %s172_s1, 4  ;;  %s18_s13 = int_to_ptr.vmem [resolvable:$true] %s17_s13  ;;  %s27_s16 = int_to_ptr.hbm [resolvable:$true] %s26_s16 }
   0x4   :  { %20 = dma.hbm_to_vmem [thread:$0]  %s16_s11, 16, %s18_s13, [#allocation3]  }
   0x5   :  { %s145_s17 = smov [#allocation5]  }
   0x6   :  { %s28_s18 = sshll.u32 %s145_s17, 4  ;;  %s29_s18 = int_to_ptr.vmem [resolvable:$true] %s28_s18 }
   0x7   :  { %31 = dma.hbm_to_vmem [thread:$0]  %s27_s16, 16, %s29_s18, [#allocation6]  }
   0x8   :  { %138 = dma.done.wait [#allocation3], 16  }
   0x9   :  { %139 = vsyncadd [#allocation3], 4294967280 }
   0xa   :  { %140 = dma.done.wait [#allocation6], 16  }
   0xb   :  { %141 = vsyncadd [#allocation6], 4294967280  ;;  %v40_v0 = vld [vmem:[#allocation2] sm:$0x1]  ;;  %v41_v1 = vld [vmem:[#allocation5] sm:$0x1] }
   0xc   :  { %vm43_vm0 = vcmask 253952   ;;  %v42_v2 = vmul.f32 %v41_v1, %v40_v0  ;;  %s61_s19 = sshll.u32 %s173_s2, 4  ;;  %s146_s21 = smov [#allocation7]   ;;  %s62_s19 = int_to_ptr.hbm [resolvable:$true] %s61_s19 }
   0xe   :  { %v44_v3 = vsel %vm43_vm0, %v42_v2, 0.0 }
   0xf   :  { %45 = vadd.xlane.f32.xlu0 %v44_v3 }
  0x82   :  { %v46_v4 = vpop.xlane.xlu0 %45 }
  0x83   :  { %v47_v5 = vrot.slane %v46_v4, 4 }
  0x85   :  { %v48_v6 = vadd.f32 %v47_v5, %v46_v4 }
  0x87   :  { %v49_v7 = vrot.slane %v48_v6, 2 }
  0x89   :  { %v50_v8 = vadd.f32 %v49_v7, %v48_v6 }
  0x8b   :  { %v51_v9 = vrot.slane %v50_v8, 1 }
  0x8d   :  { %v52_v10 = vadd.f32 %v51_v9, %v50_v8 }
  0x8f   :  { %73 = vpush %v52_v10 }
  0xc0   :  { %s74_s20 = spop %73 }
  0xc1   :  { %55 = sst [smem:[#allocation7]] %s74_s20 }
  0xc2   :  { %64 = dma.smem_to_hbm %s146_s21, 16, %s62_s19, [#allocation4]  }
  0xc3   :  { %142 = dma.done.wait [#allocation4], 16  }
  0xc4   :  { %143 = vsyncadd [#allocation4], 4294967280 }
  0xc5   :  { %69 = sfence }
  0xc6   :  { %70 = vsyncpa [#allocation3], 1 }
  0xc7   :  { %71 = vsyncpa [#allocation6], 1 }
  0xc8   :  { %72 = vsyncpa [#allocation4], 1 }

</bundles_post_ra>
